<compile_context>
chip_gen: v6e
topology: v6e:2x2x1
jax: 0.10.0
libtpu: 0.0.40
codegen_flags: <defaults>
</compile_context>

<pallas_src>
import jax
import jax.numpy as jnp
from jax.experimental import pallas as pl
from jax.experimental.pallas import tpu as pltpu

D_IN, D_H, D_OUT = 100, 256, 784


def _round_up(n, m):
    return -(-n // m) * m


def generator_kernel(x_ref, w1_ref, b1_ref, w2_ref, b2_ref, w3_ref, b3_ref, o_ref):
    # layer1: Linear(100 -> 256) + ReLU   (bf16 operands, f32 MXU accumulation)
    xb = x_ref[...].astype(jnp.bfloat16)
    h1 = jnp.dot(xb, w1_ref[...], preferred_element_type=jnp.float32) + b1_ref[...]
    h1 = jnp.maximum(h1, 0.0)
    # layer2: Linear(256 -> 256) + ReLU
    h2 = jnp.dot(h1.astype(jnp.bfloat16), w2_ref[...],
                 preferred_element_type=jnp.float32) + b2_ref[...]
    h2 = jnp.maximum(h2, 0.0)
    # layer3: Linear(256 -> 784) + Tanh, stored directly at 784 lanes
    h3 = jnp.dot(h2.astype(jnp.bfloat16), w3_ref[...],
                 preferred_element_type=jnp.float32) + b3_ref[...]
    o_ref[...] = jnp.tanh(h3).astype(o_ref.dtype)


def generator_forward(x, params, *, tb=None):
    """x: (B, 100) f32 -> (B, 784) f32.

    The grid tiles the batch dimension ("parallel" -> megacore-shardable).
    Weights/biases have constant index_maps and stay VMEM-resident; the output
    is written at its true 784-lane width so there is no wrapper-side slice.
    """
    w1, b1, w2, b2, w3, b3 = params
    B = x.shape[0]

    if tb is None:
        tb = 512 if B >= 2048 else 256  # bigger tiles amortize per-step overhead

    # Batch tile: multiple of 16 (bf16 sublane packing).  For batches >= 256,
    # cap the tile so there are at least 2 grid steps (v7x has 2 TensorCores).
    B16 = _round_up(B, 16)
    n_target = 2 if B16 >= 256 else 1
    tb_eff = min(tb, _round_up(-(-B16 // n_target), 16))
    Bp = _round_up(B, tb_eff)
    grid = (Bp // tb_eff,)

    # Only pad the batch when it is ragged w.r.t. the tile (no-op for B=16 etc.).
    xp = x if Bp == B else jnp.pad(x, ((0, Bp - B), (0, 0)))

    # One-time dtype prep of the (tiny) weights; biases stay f32.
    w1b = w1.astype(jnp.bfloat16)   # (100, 256)
    w2b = w2.astype(jnp.bfloat16)   # (256, 256)
    w3b = w3.astype(jnp.bfloat16)   # (256, 784)
    b1f = b1.astype(jnp.float32)    # (1, 256)
    b2f = b2.astype(jnp.float32)    # (1, 256)
    b3f = b3.astype(jnp.float32)    # (1, 784)

    full = lambda shape: pl.BlockSpec(shape, lambda i: (0, 0))
    out = pl.pallas_call(
        generator_kernel,
        out_shape=jax.ShapeDtypeStruct((Bp, D_OUT), jnp.float32),
        grid_spec=pltpu.PrefetchScalarGridSpec(
            num_scalar_prefetch=0,
            grid=grid,
            in_specs=[
                pl.BlockSpec((tb_eff, D_IN), lambda i: (i, 0)),  # x tile (f32, unpadded)
                full((D_IN, D_H)),                               # w1
                full((1, D_H)),                                  # b1
                full((D_H, D_H)),                                # w2
                full((1, D_H)),                                  # b2
                full((D_H, D_OUT)),                              # w3
                full((1, D_OUT)),                                # b3
            ],
            out_specs=pl.BlockSpec((tb_eff, D_OUT), lambda i: (i, 0)),
        ),
        compiler_params=pltpu.CompilerParams(
            # batch axis is embarrassingly parallel -> sharded across TCs on v7x
            dimension_semantics=("parallel",),
        ),
    )(xp, w1b, b1f, w2b, b2f, w3b, b3f)

    return out if Bp == B else out[:B]


def init_params(key):
    k1, k2, k3, k4, k5, k6 = jax.random.split(key, 6)

    # Deterministic synthetic init (uniform, roughly PyTorch's default fan-in scaling).
    def lin(kw, kb, fan_in, fan_out):
        bound = 1.0 / jnp.sqrt(fan_in)
        w = jax.random.uniform(kw, (fan_in, fan_out), jnp.float32, -bound, bound)
        b = jax.random.uniform(kb, (1, fan_out), jnp.float32, -bound, bound)
        return w, b

    w1, b1 = lin(k1, k2, D_IN, D_H)
    w2, b2 = lin(k3, k4, D_H, D_H)
    w3, b3 = lin(k5, k6, D_H, D_OUT)
    return (w1, b1, w2, b2, w3, b3)


def reference_forward(x, params):
    """Pure-JAX reference mirroring the kernel's bf16-operand / f32-accumulate math."""
    w1, b1, w2, b2, w3, b3 = params
    bf = lambda a: a.astype(jnp.bfloat16).astype(jnp.float32)
    h1 = jnp.maximum(bf(x) @ bf(w1) + b1, 0.0)
    h2 = jnp.maximum(bf(h1) @ bf(w2) + b2, 0.0)
    return jnp.tanh(bf(h2) @ bf(w3) + b3)


if __name__ == "__main__":
    key = jax.random.PRNGKey(0)
    kx, kp = jax.random.split(key)
    B = 16  # small deterministic example batch
    x = jax.random.normal(kx, (B, D_IN), jnp.float32)
    params = init_params(kp)

    out = jax.block_until_ready(generator_forward(x, params))

    ref = reference_forward(x, params)
    assert out.shape == (B, D_OUT), out.shape
    max_err = float(jnp.max(jnp.abs(out - ref)))
    assert jnp.allclose(out, ref, atol=5e-3, rtol=5e-3), f"mismatch vs reference, max err {max_err}"
    print("KERNEL_OK")
</pallas_src>

<mosaic_0001>
module attributes {stable_mosaic.version = 11 : i64} {
  func.func @generator_kernel(%arg0: i32, %arg1: memref<16x100xf32, #tpu.memory_space<vmem>>, %arg2: memref<100x256xbf16, #tpu.memory_space<vmem>>, %arg3: memref<1x256xf32, #tpu.memory_space<vmem>>, %arg4: memref<256x256xbf16, #tpu.memory_space<vmem>>, %arg5: memref<1x256xf32, #tpu.memory_space<vmem>>, %arg6: memref<256x784xbf16, #tpu.memory_space<vmem>>, %arg7: memref<1x784xf32, #tpu.memory_space<vmem>>, %arg8: memref<16x784xf32, #tpu.memory_space<vmem>>) attributes {dimension_semantics = [#tpu.dimension_semantics<parallel>], iteration_bounds = array<i64: 1>, scalar_prefetch = 0 : i64, scratch_operands = 0 : i64, tpu.core_type = #tpu.core_type<tc>, window_params = [{transform_indices = @transform_0, window_bounds = array<i64: 16, 100>}, {pipeline_mode = #tpu.pipeline_mode<synchronous>, transform_indices = @transform_1, window_bounds = array<i64: 100, 256>}, {pipeline_mode = #tpu.pipeline_mode<synchronous>, transform_indices = @transform_2, window_bounds = array<i64: 1, 256>}, {pipeline_mode = #tpu.pipeline_mode<synchronous>, transform_indices = @transform_3, window_bounds = array<i64: 256, 256>}, {pipeline_mode = #tpu.pipeline_mode<synchronous>, transform_indices = @transform_4, window_bounds = array<i64: 1, 256>}, {pipeline_mode = #tpu.pipeline_mode<synchronous>, transform_indices = @transform_5, window_bounds = array<i64: 256, 784>}, {pipeline_mode = #tpu.pipeline_mode<synchronous>, transform_indices = @transform_6, window_bounds = array<i64: 1, 784>}, {transform_indices = @transform_7, window_bounds = array<i64: 16, 784>}]} {
    %c0 = arith.constant 0 : index
    %c0_0 = arith.constant 0 : index
    %0 = vector.load %arg1[%c0, %c0_0] : memref<16x100xf32, #tpu.memory_space<vmem>>, vector<16x100xf32>
    %1 = arith.truncf %0 : vector<16x100xf32> to vector<16x100xbf16>
    %c0_1 = arith.constant 0 : index
    %c0_2 = arith.constant 0 : index
    %2 = vector.load %arg2[%c0_1, %c0_2] : memref<100x256xbf16, #tpu.memory_space<vmem>>, vector<100x256xbf16>
    %cst = arith.constant dense<0.000000e+00> : vector<16x256xf32>
    %3 = tpu.matmul %1, %2, %cst {dimension_numbers = #tpu.dot_dimension_numbers<[1], [0], [0], [1], [0, 0, 1, 1], [], []>} : vector<16x100xbf16>, vector<100x256xbf16>, vector<16x256xf32> -> vector<16x256xf32>
    %c0_3 = arith.constant 0 : index
    %c0_4 = arith.constant 0 : index
    %4 = vector.load %arg3[%c0_3, %c0_4] : memref<1x256xf32, #tpu.memory_space<vmem>>, vector<1x256xf32>
    %5 = vector.broadcast %4 : vector<1x256xf32> to vector<16x256xf32>
    %6 = arith.addf %3, %5 : vector<16x256xf32>
    %cst_5 = arith.constant 0.000000e+00 : f32
    %7 = vector.broadcast %cst_5 : f32 to vector<16x256xf32>
    %8 = arith.maximumf %6, %7 : vector<16x256xf32>
    %9 = arith.truncf %8 : vector<16x256xf32> to vector<16x256xbf16>
    %c0_6 = arith.constant 0 : index
    %c0_7 = arith.constant 0 : index
    %10 = vector.load %arg4[%c0_6, %c0_7] : memref<256x256xbf16, #tpu.memory_space<vmem>>, vector<256x256xbf16>
    %cst_8 = arith.constant dense<0.000000e+00> : vector<16x256xf32>
    %11 = tpu.matmul %9, %10, %cst_8 {dimension_numbers = #tpu.dot_dimension_numbers<[1], [0], [0], [1], [0, 0, 1, 1], [], []>} : vector<16x256xbf16>, vector<256x256xbf16>, vector<16x256xf32> -> vector<16x256xf32>
    %c0_9 = arith.constant 0 : index
    %c0_10 = arith.constant 0 : index
    %12 = vector.load %arg5[%c0_9, %c0_10] : memref<1x256xf32, #tpu.memory_space<vmem>>, vector<1x256xf32>
    %13 = vector.broadcast %12 : vector<1x256xf32> to vector<16x256xf32>
    %14 = arith.addf %11, %13 : vector<16x256xf32>
    %cst_11 = arith.constant 0.000000e+00 : f32
    %15 = vector.broadcast %cst_11 : f32 to vector<16x256xf32>
    %16 = arith.maximumf %14, %15 : vector<16x256xf32>
    %17 = arith.truncf %16 : vector<16x256xf32> to vector<16x256xbf16>
    %c0_12 = arith.constant 0 : index
    %c0_13 = arith.constant 0 : index
    %18 = vector.load %arg6[%c0_12, %c0_13] : memref<256x784xbf16, #tpu.memory_space<vmem>>, vector<256x784xbf16>
    %cst_14 = arith.constant dense<0.000000e+00> : vector<16x784xf32>
    %19 = tpu.matmul %17, %18, %cst_14 {dimension_numbers = #tpu.dot_dimension_numbers<[1], [0], [0], [1], [0, 0, 1, 1], [], []>} : vector<16x256xbf16>, vector<256x784xbf16>, vector<16x784xf32> -> vector<16x784xf32>
    %c0_15 = arith.constant 0 : index
    %c0_16 = arith.constant 0 : index
    %20 = vector.load %arg7[%c0_15, %c0_16] : memref<1x784xf32, #tpu.memory_space<vmem>>, vector<1x784xf32>
    %21 = vector.broadcast %20 : vector<1x784xf32> to vector<16x784xf32>
    %22 = arith.addf %19, %21 : vector<16x784xf32>
    %23 = math.tanh %22 : vector<16x784xf32>
    %c0_17 = arith.constant 0 : index
    %c0_18 = arith.constant 0 : index
    %24 = vector.load %arg8[%c0_17, %c0_18] : memref<16x784xf32, #tpu.memory_space<vmem>>, vector<16x784xf32>
    tpu.vector_store %arg8[%c0_17, %c0_18], %23 {strides = array<i32>} : memref<16x784xf32, #tpu.memory_space<vmem>>, vector<16x784xf32>,
    return
  }
  func.func @transform_0(%arg0: i32) -> (i32, i32) {
    %c0_i32 = arith.constant 0 : i32
    %c0_i32_0 = arith.constant 0 : i32
    return %arg0, %c0_i32 : i32, i32
  }
  func.func @transform_1(%arg0: i32) -> (i32, i32) {
    %c0_i32 = arith.constant 0 : i32
    %c0_i32_0 = arith.constant 0 : i32
    %c0_i32_1 = arith.constant 0 : i32
    return %c0_i32, %c0_i32_0 : i32, i32
  }
  func.func @transform_2(%arg0: i32) -> (i32, i32) {
    %c0_i32 = arith.constant 0 : i32
    %c0_i32_0 = arith.constant 0 : i32
    %c0_i32_1 = arith.constant 0 : i32
    return %c0_i32, %c0_i32_0 : i32, i32
  }
  func.func @transform_3(%arg0: i32) -> (i32, i32) {
    %c0_i32 = arith.constant 0 : i32
    %c0_i32_0 = arith.constant 0 : i32
    %c0_i32_1 = arith.constant 0 : i32
    return %c0_i32, %c0_i32_0 : i32, i32
  }
  func.func @transform_4(%arg0: i32) -> (i32, i32) {
    %c0_i32 = arith.constant 0 : i32
    %c0_i32_0 = arith.constant 0 : i32
    %c0_i32_1 = arith.constant 0 : i32
    return %c0_i32, %c0_i32_0 : i32, i32
  }
  func.func @transform_5(%arg0: i32) -> (i32, i32) {
    %c0_i32 = arith.constant 0 : i32
    %c0_i32_0 = arith.constant 0 : i32
    %c0_i32_1 = arith.constant 0 : i32
    return %c0_i32, %c0_i32_0 : i32, i32
  }
  func.func @transform_6(%arg0: i32) -> (i32, i32) {
    %c0_i32 = arith.constant 0 : i32
    %c0_i32_0 = arith.constant 0 : i32
    %c0_i32_1 = arith.constant 0 : i32
    return %c0_i32, %c0_i32_0 : i32, i32
  }
  func.func @transform_7(%arg0: i32) -> (i32, i32) {
    %c0_i32 = arith.constant 0 : i32
    %c0_i32_0 = arith.constant 0 : i32
    return %arg0, %c0_i32 : i32, i32
  }
}

</mosaic_0001>

<bundles_post_ra>
// kernel: tpu_custom_call.1
= control target key start
LH: loop header
LB: loop body
LE: loop exit
PB: predicated region body
PF: predicated region fallthrough
CT: control target
= control target key end

     0   :  { %vm125_vm0 = vcmask 1041408   ;;  %v1854_v4 = vmov 0   ;;  %vm121_vm1 = vcmask 818176   ;;  %s2421_s0 = inlined_call_operand.vmem [shape: f32[16,100], index: 0, kind: input, shape index: {}]   ;;  %s2422_s1 = inlined_call_operand.vmem [shape: bf16[100,256], index: 1, kind: input, shape index: {}]   ;;  %s2423_s2 = inlined_call_operand.vmem [shape: f32[1,256], index: 2, kind: input, shape index: {}]   ;;  %s2424_s3 = inlined_call_operand.vmem [shape: bf16[256,256], index: 3, kind: input, shape index: {}]   ;;  %s2425_s4 = inlined_call_operand.vmem [shape: f32[1,256], index: 4, kind: input, shape index: {}]   ;;  %s2426_s5 = inlined_call_operand.vmem [shape: bf16[256,784], index: 5, kind: input, shape index: {}]   ;;  %s2427_s6 = inlined_call_operand.vmem [shape: f32[1,784], index: 6, kind: input, shape index: {}]   ;;  %s2428_s7 = inlined_call_operand.hbm [shape: f32[16,784], index: 7, kind: output, shape index: {}]  }
   0x1   :  { %v43_v0 = vld [vmem:[%s2422_s1 + $0x60] sm:$0x33]  ;;  %v1578_v3 = vld [vmem:[%s2422_s1 + $0x54] ss:$8 sps:$4 sm:$0xff]   ;;  %164 = vmatprep.mubr.bf16.mxu0 %v1854_v4  ;;  %v1580_v6 = vld [vmem:[%s2422_s1 + $0x50] ss:$8 sps:$4 sm:$0xff]  }
   0x2   :  { %v1403_v1 = vcombine.high %v43_v0, %v43_v0  ;;  %v1402_v2 = vcombine.low %v43_v0, %v43_v0  ;;  %v1581_v7 = vld [vmem:[%s2422_s1 + $0x44] ss:$8 sps:$4 sm:$0xff]   ;;  %v1583_v8 = vld [vmem:[%s2422_s1 + $0x40] ss:$8 sps:$4 sm:$0xff]   ;;  %v1584_v9 = vld [vmem:[%s2422_s1 + $0x34] ss:$8 sps:$4 sm:$0xff]  }
   0x3   :  { %v1596_v10 = vld [vmem:[%s2424_s3 + $0x74] ss:$8 sps:$4 sm:$0xff]   ;;  %v1598_v11 = vld [vmem:[%s2424_s3 + $0x70] ss:$8 sps:$4 sm:$0xff]   ;;  %v1599_v13 = vld [vmem:[%s2424_s3 + $0x64] ss:$8 sps:$4 sm:$0xff]  }
   0x4   :  { %1404 = vmatprep.subr.msk.bf16.mxu0 %vm125_vm0, %v1403_v1  ;;  %v127_v5 = vsel %vm125_vm0, %v1402_v2, 0  ;;  %v1586_v12 = vld [vmem:[%s2422_s1 + $0x30] ss:$8 sps:$4 sm:$0xff]   ;;  %385 = vmatprep.subr.bf16.mxu1 %v1596_v10  ;;  %v1587_v14 = vld [vmem:[%s2422_s1 + $0x24] ss:$8 sps:$4 sm:$0xff]  }
   0x5   :  { %135 = vmatpush1.bf16.msra.mxu0 %v127_v5  ;;  %386 = vmatpush1.bf16.msra.mxu1 %v1598_v11  ;;  %v1601_v15 = vld [vmem:[%s2424_s3 + $0x60] ss:$8 sps:$4 sm:$0xff]   ;;  %v1602_v16 = vld [vmem:[%s2424_s3 + $0x54] ss:$8 sps:$4 sm:$0xff]   ;;  %v1604_v19 = vld [vmem:[%s2424_s3 + $0x50] ss:$8 sps:$4 sm:$0xff]  }
   0x6   :  { %136 = vmatprep.subr.bf16.mxu0 %v1578_v3  ;;  %387 = vmatprep.subr.bf16.mxu1 %v1599_v13  ;;  %v1589_v17 = vld [vmem:[%s2422_s1 + $0x20] ss:$8 sps:$4 sm:$0xff]   ;;  %v1590_v18 = vld [vmem:[%s2422_s1 + $0x14] ss:$8 sps:$4 sm:$0xff]   ;;  %v1605_v20 = vld [vmem:[%s2424_s3 + $0x44] ss:$8 sps:$4 sm:$0xff]  }
   0x7   :  { %v1592_v21 = vld [vmem:[%s2422_s1 + $0x10] ss:$8 sps:$4 sm:$0xff]   ;;  %v1593_v22 = vld [vmem:[%s2422_s1 + $0x4] ss:$8 sps:$4 sm:$0xff]   ;;  %v1607_v23 = vld [vmem:[%s2424_s3 + $0x40] ss:$8 sps:$4 sm:$0xff]  }
   0x8   :  { %v1608_v24 = vld [vmem:[%s2424_s3 + $0x34] ss:$8 sps:$4 sm:$0xff]   ;;  %v1595_v25 = vld [vmem:[%s2422_s1] ss:$8 sps:$4 sm:$0xff]   ;;  %v1610_v28 = vld [vmem:[%s2424_s3 + $0x30] ss:$8 sps:$4 sm:$0xff]  }
   0x9   :  { %137 = vmatpush1.bf16.msra.mxu0 %v1580_v6  ;;  %388 = vmatpush1.bf16.msra.mxu1 %v1601_v15  ;;  %v28_v26 = vld [vmem:[%s2421_s0] sm:$0xff]  ;;  %v29_v27 = vld [vmem:[%s2421_s0 + $0x8] sm:$0xff]  ;;  %v1614_v32 = vld [vmem:[%s2424_s3 + $0x14] ss:$8 sps:$4 sm:$0xff]  }
   0xa   :  { %138 = vmatprep.subr.bf16.mxu0 %v1581_v7  ;;  %389 = vmatprep.subr.bf16.mxu1 %v1602_v16  ;;  %v1611_v29 = vld [vmem:[%s2424_s3 + $0x24] ss:$8 sps:$4 sm:$0xff]   ;;  %v1613_v30 = vld [vmem:[%s2424_s3 + $0x20] ss:$8 sps:$4 sm:$0xff]   ;;  %v30_v31 = vpack.c.bf16 %v29_v27, %v28_v26  ;;  %v1616_v33 = vld [vmem:[%s2424_s3 + $0x10] ss:$8 sps:$4 sm:$0xff]  }
   0xb   :  { %v1617_v34 = vld [vmem:[%s2424_s3 + $0x4] ss:$8 sps:$4 sm:$0xff]   ;;  %v1619_v35 = vld [vmem:[%s2424_s3] ss:$8 sps:$4 sm:$0xff]   ;;  %v1620_v36 = vld [vmem:[%s2424_s3 + $0xf4] ss:$8 sps:$4 sm:$0xff]  }
   0xc   :  { %v1622_v37 = vld [vmem:[%s2424_s3 + $0xf0] ss:$8 sps:$4 sm:$0xff]   ;;  %v1623_v38 = vld [vmem:[%s2424_s3 + $0xe4] ss:$8 sps:$4 sm:$0xff]   ;;  %v1625_v39 = vld [vmem:[%s2424_s3 + $0xe0] ss:$8 sps:$4 sm:$0xff]  }
   0xd   :  { %139 = vmatpush1.bf16.msra.mxu0 %v1583_v8  ;;  %390 = vmatpush1.bf16.msra.mxu1 %v1604_v19  ;;  %v1626_v40 = vld [vmem:[%s2424_s3 + $0xd4] ss:$8 sps:$4 sm:$0xff]   ;;  %v1628_v41 = vld [vmem:[%s2424_s3 + $0xd0] ss:$8 sps:$4 sm:$0xff]   ;;  %v1629_v42 = vld [vmem:[%s2424_s3 + $0xc4] ss:$8 sps:$4 sm:$0xff]  }
   0xe   :  { %140 = vmatprep.subr.bf16.mxu0 %v1584_v9  ;;  %391 = vmatprep.subr.bf16.mxu1 %v1605_v20  ;;  %v1631_v43 = vld [vmem:[%s2424_s3 + $0xc0] ss:$8 sps:$4 sm:$0xff]   ;;  %v1632_v44 = vld [vmem:[%s2424_s3 + $0xb4] ss:$8 sps:$4 sm:$0xff]   ;;  %v1634_v45 = vld [vmem:[%s2424_s3 + $0xb0] ss:$8 sps:$4 sm:$0xff]  }
  0x11   :  { %141 = vmatpush1.bf16.msra.mxu0 %v1586_v12  ;;  %392 = vmatpush1.bf16.msra.mxu1 %v1607_v23 }
  0x12   :  { %142 = vmatprep.subr.bf16.mxu0 %v1587_v14  ;;  %393 = vmatprep.subr.bf16.mxu1 %v1608_v24 }
  0x15   :  { %143 = vmatpush1.bf16.msra.mxu0 %v1589_v17  ;;  %394 = vmatpush1.bf16.msra.mxu1 %v1610_v28 }
  0x16   :  { %144 = vmatprep.subr.bf16.mxu0 %v1590_v18  ;;  %395 = vmatprep.subr.bf16.mxu1 %v1611_v29 }
  0x19   :  { %145 = vmatpush1.bf16.msra.mxu0 %v1592_v21  ;;  %396 = vmatpush1.bf16.msra.mxu1 %v1613_v30 }
  0x1a   :  { %146 = vmatprep.subr.bf16.mxu0 %v1593_v22  ;;  %397 = vmatprep.subr.bf16.mxu1 %v1614_v32 }
  0x1d   :  { %147 = vmatpush1.bf16.msra.mxu0 %v1595_v25  ;;  %398 = vmatpush1.bf16.msra.mxu1 %v1616_v33 }
  0x1e   :  { %399 = vmatprep.subr.bf16.mxu1 %v1617_v34 }
  0x20   :  { %1405 = vmatmul.mubr.msk.bf16.vlgmr.msra.gmra.mxu0 %vm121_vm1, %v30_v31 }
  0x21   :  { %400 = vmatpush1.bf16.msra.mxu1 %v1619_v35 }
  0x22   :  { %401 = vmatprep.subr.bf16.mxu1 %v1620_v36 }
  0x25   :  { %402 = vmatpush2.bf16.msra.mxu1 %v1622_v37 }
  0x26   :  { %403 = vmatprep.subr.bf16.mxu1 %v1623_v38 }
  0x29   :  { %404 = vmatpush2.bf16.msra.mxu1 %v1625_v39 }
  0x2a   :  { %405 = vmatprep.subr.bf16.mxu1 %v1626_v40 }
  0x2d   :  { %406 = vmatpush2.bf16.msra.mxu1 %v1628_v41 }
  0x2e   :  { %407 = vmatprep.subr.bf16.mxu1 %v1629_v42 }
  0x31   :  { %408 = vmatpush2.bf16.msra.mxu1 %v1631_v43 }
  0x32   :  { %409 = vmatprep.subr.bf16.mxu1 %v1632_v44 }
  0x35   :  { %410 = vmatpush2.bf16.msra.mxu1 %v1634_v45 }
  0x36   :  { %12 = vsyncpa [#allocation3], 0  ;;  %v1635_v46 = vld [vmem:[%s2424_s3 + $0xa4] ss:$8 sps:$4 sm:$0xff]   ;;  %v1637_v47 = vld [vmem:[%s2424_s3 + $0xa0] ss:$8 sps:$4 sm:$0xff]   ;;  %v46_v15 = vlaneseq }
  0x37   :  { %411 = vmatprep.subr.bf16.mxu1 %v1635_v46  ;;  %v1638_v48 = vld [vmem:[%s2424_s3 + $0x94] ss:$8 sps:$4 sm:$0xff]   ;;  %v1640_v49 = vld [vmem:[%s2424_s3 + $0x90] ss:$8 sps:$4 sm:$0xff]   ;;  %v1641_v50 = vld [vmem:[%s2424_s3 + $0x84] ss:$8 sps:$4 sm:$0xff]  }
  0x38   :  { %v1643_v51 = vld [vmem:[%s2424_s3 + $0x80] ss:$8 sps:$4 sm:$0xff]   ;;  %v1649_v54 = vld [vmem:[%s2426_s5 + $0x194] ss:$28 sps:$4 sm:$0xff]   ;;  %v1658_v57 = vld [vmem:[%s2426_s5 + $0x11c] ss:$28 sps:$4 sm:$0xff]  }
  0x39   :  { %412 = vmatpush2.bf16.msra.mxu1 %v1637_v47  ;;  %v1644_v52 = vld [vmem:[%s2426_s5 + $0x188] ss:$28 sps:$4 sm:$0xff]   ;;  %v1652_v55 = vld [vmem:[%s2426_s5 + $0x154] ss:$28 sps:$4 sm:$0xff]   ;;  %v1662_v60 = vld [vmem:[%s2426_s5 + $0xe0] ss:$28 sps:$4 sm:$0xff]  }
  0x3a   :  { %413 = vmatprep.subr.bf16.mxu1 %v1638_v48  ;;  %v1646_v53 = vld [vmem:[%s2426_s5 + $0x18c] ss:$28 sps:$4 sm:$0xff]   ;;  %v1656_v58 = vld [vmem:[%s2426_s5 + $0x118] ss:$28 sps:$4 sm:$0xff]   ;;  %v1664_v59 = vld [vmem:[%s2426_s5 + $0xe4] ss:$28 sps:$4 sm:$0xff]  }
  0x3b   :  { %1175 = vmatprep.subr.bf16.mxu0 %v1646_v53  ;;  %v1650_v56 = vld [vmem:[%s2426_s5 + $0x150] ss:$28 sps:$4 sm:$0xff]   ;;  %v1668_v62 = vld [vmem:[%s2426_s5 + $0xa8] ss:$28 sps:$4 sm:$0xff]   ;;  %v1682_v1 = vld [vmem:[%s2426_s5 + $0x3c] ss:$28 sps:$4 sm:$0xff]  }
  0x3c   :  { %1176 = vmatpush1.bf16.msra.mxu0 %v1644_v52  ;;  %v1670_v61 = vld [vmem:[%s2426_s5 + $0xac] ss:$28 sps:$4 sm:$0xff]   ;;  %v1676_v63 = vld [vmem:[%s2426_s5 + $0x74] ss:$28 sps:$4 sm:$0xff]   ;;  %v1688_v3 = vld [vmem:[%s2426_s5 + $0x4] ss:$28 sps:$4 sm:$0xff]  }
  0x3d   :  { %414 = vmatpush2.bf16.msra.mxu1 %v1640_v49  ;;  %1177 = vmatprep.subr.bf16.mxu0 %v1652_v55  ;;  %v1674_v0 = vld [vmem:[%s2426_s5 + $0x70] ss:$28 sps:$4 sm:$0xff]   ;;  %v1680_v2 = vld [vmem:[%s2426_s5 + $0x38] ss:$28 sps:$4 sm:$0xff]   ;;  %v1686_v4 = vld [vmem:[%s2426_s5] ss:$28 sps:$4 sm:$0xff]  }
  0x3e   :  { %415 = vmatprep.subr.bf16.mxu1 %v1641_v50  ;;  %v1694_v5 = vld [vmem:[%s2426_s5 + $0x34c] ss:$28 sps:$4 sm:$0xff]   ;;  %v1700_v7 = vld [vmem:[%s2426_s5 + $0x314] ss:$28 sps:$4 sm:$0xff]   ;;  %v1706_v9 = vld [vmem:[%s2426_s5 + $0x2dc] ss:$28 sps:$4 sm:$0xff]  }
  0x3f   :  { %v1692_v6 = vld [vmem:[%s2426_s5 + $0x348] ss:$28 sps:$4 sm:$0xff]   ;;  %v1698_v8 = vld [vmem:[%s2426_s5 + $0x310] ss:$28 sps:$4 sm:$0xff]   ;;  %v1704_v10 = vld [vmem:[%s2426_s5 + $0x2d8] ss:$28 sps:$4 sm:$0xff]  }
  0x40   :  { %1178 = vmatpush1.bf16.msra.mxu0 %v1650_v56  ;;  %v1712_v11 = vld [vmem:[%s2426_s5 + $0x2a4] ss:$28 sps:$4 sm:$0xff]   ;;  %v1718_v13 = vld [vmem:[%s2426_s5 + $0x26c] ss:$28 sps:$4 sm:$0xff]   ;;  %v2120_v16 = vshrl.u32 %v46_v15, 7  ;;  %vm1365_vm2 = vcmask 130048  }
  0x41   :  { %416 = vmatpush2.bf16.msra.mxu1 %v1643_v51  ;;  %1179 = vmatprep.subr.bf16.mxu0 %v1658_v57  ;;  %v1710_v12 = vld [vmem:[%s2426_s5 + $0x2a0] ss:$28 sps:$4 sm:$0xff]   ;;  %v1716_v14 = vld [vmem:[%s2426_s5 + $0x268] ss:$28 sps:$4 sm:$0xff]   ;;  %v1647_v35 = vld [vmem:[%s2426_s5 + $0x190] ss:$28 sps:$4 sm:$0xff]  }
  0x42   :  { %1218 = vmatprep.subr.bf16.mxu1 %v1649_v54  ;;  %v2123_v17 = vsub.s32 1, %v2120_v16  ;;  %v2126_v18 = vsub.s32 0, %v2120_v16  ;;  %v44_v19 = vld [vmem:[%s2423_s2] sm:$0x3]  ;;  %v1655_v37 = vld [vmem:[%s2426_s5 + $0x15c] ss:$28 sps:$4 sm:$0xff]  }
  0x43   :  { %v1653_v38 = vld [vmem:[%s2426_s5 + $0x158] ss:$28 sps:$4 sm:$0xff]   ;;  %v1661_v39 = vld [vmem:[%s2426_s5 + $0x124] ss:$28 sps:$4 sm:$0xff]   ;;  %v1667_v41 = vld [vmem:[%s2426_s5 + $0xec] ss:$28 sps:$4 sm:$0xff]  }
  0x44   :  { %1180 = vmatpush1.bf16.msra.mxu0 %v1656_v58  ;;  %v53_v21 = vrot.slane %v44_v19, %v2123_v17  ;;  %v49_v22 = vrot.slane %v44_v19, %v2126_v18  ;;  %v1659_v40 = vld [vmem:[%s2426_s5 + $0x120] ss:$28 sps:$4 sm:$0xff]   ;;  %v1665_v42 = vld [vmem:[%s2426_s5 + $0xe8] ss:$28 sps:$4 sm:$0xff]   ;;  %v1673_v43 = vld [vmem:[%s2426_s5 + $0xb4] ss:$28 sps:$4 sm:$0xff]  }
  0x45   :  { %1181 = vmatprep.subr.bf16.mxu0 %v1664_v59  ;;  %v1671_v44 = vld [vmem:[%s2426_s5 + $0xb0] ss:$28 sps:$4 sm:$0xff]   ;;  %v1679_v45 = vld [vmem:[%s2426_s5 + $0x7c] ss:$28 sps:$4 sm:$0xff]   ;;  %v1685_v47 = vld [vmem:[%s2426_s5 + $0x44] ss:$28 sps:$4 sm:$0xff]  }
  0x46   :  { %v1677_v46 = vld [vmem:[%s2426_s5 + $0x78] ss:$28 sps:$4 sm:$0xff]   ;;  %v1683_v48 = vld [vmem:[%s2426_s5 + $0x40] ss:$28 sps:$4 sm:$0xff]   ;;  %v1691_v49 = vld [vmem:[%s2426_s5 + $0xc] ss:$28 sps:$4 sm:$0xff]  }
  0x47   :  { %v1689_v50 = vld [vmem:[%s2426_s5 + $0x8] ss:$28 sps:$4 sm:$0xff]   ;;  %v1697_v51 = vld [vmem:[%s2426_s5 + $0x354] ss:$28 sps:$4 sm:$0xff]   ;;  %v1703_v53 = vld [vmem:[%s2426_s5 + $0x31c] ss:$28 sps:$4 sm:$0xff]  }
  0x48   :  { %1182 = vmatpush1.bf16.msra.mxu0 %v1662_v60  ;;  %v1695_v52 = vld [vmem:[%s2426_s5 + $0x350] ss:$28 sps:$4 sm:$0xff]   ;;  %v1701_v54 = vld [vmem:[%s2426_s5 + $0x318] ss:$28 sps:$4 sm:$0xff]   ;;  %v1709_v55 = vld [vmem:[%s2426_s5 + $0x2e4] ss:$28 sps:$4 sm:$0xff]  }
  0x49   :  { %1183 = vmatprep.subr.bf16.mxu0 %v1670_v61  ;;  %v1707_v56 = vld [vmem:[%s2426_s5 + $0x2e0] ss:$28 sps:$4 sm:$0xff]   ;;  %v1715_v57 = vld [vmem:[%s2426_s5 + $0x2ac] ss:$28 sps:$4 sm:$0xff]   ;;  %v1721_v59 = vld [vmem:[%s2426_s5 + $0x274] ss:$28 sps:$4 sm:$0xff]  }
  0x4a   :  { %v1713_v58 = vld [vmem:[%s2426_s5 + $0x2a8] ss:$28 sps:$4 sm:$0xff]   ;;  %v1719_v60 = vld [vmem:[%s2426_s5 + $0x270] ss:$28 sps:$4 sm:$0xff]  }
  0x4b   :  { %v1724_v61 = vld [vmem:[%s2426_s5 + $0x234] ss:$28 sps:$4 sm:$0xff]  }
  0x4c   :  { %1184 = vmatpush1.bf16.msra.mxu0 %v1668_v62  ;;  %v1727_v62 = vld [vmem:[%s2426_s5 + $0x23c] ss:$28 sps:$4 sm:$0xff]  }
  0x4d   :  { %1185 = vmatprep.subr.bf16.mxu0 %v1676_v63  ;;  %v1722_v63 = vld [vmem:[%s2426_s5 + $0x230] ss:$28 sps:$4 sm:$0xff]  }
  0x50   :  { %1186 = vmatpush1.bf16.msra.mxu0 %v1674_v0  ;;  %v1725_v0 = vld [vmem:[%s2426_s5 + $0x238] ss:$28 sps:$4 sm:$0xff]  }
  0x51   :  { %1187 = vmatprep.subr.bf16.mxu0 %v1682_v1  ;;  %v1730_v1 = vld [vmem:[%s2426_s5 + $0x1fc] ss:$28 sps:$4 sm:$0xff]  }
  0x54   :  { %1188 = vmatpush1.bf16.msra.mxu0 %v1680_v2  ;;  %v1733_v2 = vld [vmem:[%s2426_s5 + $0x204] ss:$28 sps:$4 sm:$0xff]  }
  0x55   :  { %1189 = vmatprep.subr.bf16.mxu0 %v1688_v3  ;;  %v1728_v3 = vld [vmem:[%s2426_s5 + $0x1f8] ss:$28 sps:$4 sm:$0xff]  }
  0x58   :  { %1190 = vmatpush1.bf16.msra.mxu0 %v1686_v4  ;;  %v1731_v4 = vld [vmem:[%s2426_s5 + $0x200] ss:$28 sps:$4 sm:$0xff]  }
  0x59   :  { %1191 = vmatprep.subr.bf16.mxu0 %v1694_v5  ;;  %v1736_v5 = vld [vmem:[%s2426_s5 + $0x1c4] ss:$28 sps:$4 sm:$0xff]  }
  0x5c   :  { %1192 = vmatpush2.bf16.msra.mxu0 %v1692_v6  ;;  %v1739_v6 = vld [vmem:[%s2426_s5 + $0x1cc] ss:$28 sps:$4 sm:$0xff]  }
  0x5d   :  { %1193 = vmatprep.subr.bf16.mxu0 %v1700_v7  ;;  %v1734_v7 = vld [vmem:[%s2426_s5 + $0x1c0] ss:$28 sps:$4 sm:$0xff]  }
  0x60   :  { %1194 = vmatpush2.bf16.msra.mxu0 %v1698_v8  ;;  %v1737_v8 = vld [vmem:[%s2426_s5 + $0x1c8] ss:$28 sps:$4 sm:$0xff]  }
  0x61   :  { %1195 = vmatprep.subr.bf16.mxu0 %v1706_v9  ;;  %v1742_v9 = vld [vmem:[%s2426_s5 + $0x19c] ss:$28 sps:$4 sm:$0xff]  }
  0x64   :  { %1196 = vmatpush2.bf16.msra.mxu0 %v1704_v10  ;;  %v1743_v10 = vld [vmem:[%s2426_s5 + $0x360] ss:$28 sps:$4 sm:$0xff]  }
  0x65   :  { %1197 = vmatprep.subr.bf16.mxu0 %v1712_v11  ;;  %v213_v11 = vld [vmem:[%s2425_s4] sm:$0x3] }
  0x68   :  { %1198 = vmatpush2.bf16.msra.mxu0 %v1710_v12 }
  0x69   :  { %1199 = vmatprep.subr.bf16.mxu0 %v1718_v13  ;;  %v222_v13 = vrot.slane %v213_v11, %v2123_v17 }
  0x6c   :  { %1200 = vmatpush2.bf16.msra.mxu0 %v1716_v14  ;;  %v218_v14 = vrot.slane %v213_v11, %v2126_v18  ;;  %v1803_v11 = vld [vmem:[%s2426_s5 + $0x1d4] ss:$28 sps:$4 sm:$0xff]  }
  0x6d   :  { %1201 = vmatprep.subr.bf16.mxu0 %v1724_v61  ;;  %v1782_v61 = vld [vmem:[%s2426_s5 + $0x35c] ss:$28 sps:$4 sm:$0xff]  }
  0x70   :  { %1202 = vmatpush2.bf16.msra.mxu0 %v1722_v63  ;;  %v1785_v63 = vld [vmem:[%s2426_s5 + $0x324] ss:$28 sps:$4 sm:$0xff]  }
  0x71   :  { %1203 = vmatprep.subr.bf16.mxu0 %v1730_v1  ;;  %v1788_v1 = vld [vmem:[%s2426_s5 + $0x2ec] ss:$28 sps:$4 sm:$0xff]  }
  0x74   :  { %1204 = vmatpush2.bf16.msra.mxu0 %v1728_v3  ;;  %v1791_v3 = vld [vmem:[%s2426_s5 + $0x2b4] ss:$28 sps:$4 sm:$0xff]  }
  0x75   :  { %1205 = vmatprep.subr.bf16.mxu0 %v1736_v5  ;;  %v1794_v5 = vld [vmem:[%s2426_s5 + $0x27c] ss:$28 sps:$4 sm:$0xff]  }
  0x78   :  { %1206 = vmatpush2.bf16.msra.mxu0 %v1734_v7  ;;  %v1797_v7 = vld [vmem:[%s2426_s5 + $0x244] ss:$28 sps:$4 sm:$0xff]  }
  0x79   :  { %1261 = vmatprep.subr.bf16.mxu0 %v1742_v9  ;;  %v1800_v9 = vld [vmem:[%s2426_s5 + $0x20c] ss:$28 sps:$4 sm:$0xff]  }
  0xe0   :  { %v166_v20 = vpop.f32.mrf.mxu0 }
  0xe1   :  { %v167_v27 = vadd.f32 %v166_v20, %v49_v22 }
  0xe2   :  { %v168_v23 = vpop.f32.mrf.mxu0 }
  0xe3   :  { %v169_v25 = vadd.f32 %v168_v23, %v53_v21  ;;  %v175_v33 = vmax.f32 %v167_v27, 0.0 }
  0xe4   :  { %v170_v24 = vpop.f32.mrf.mxu0 }
  0xe5   :  { %v171_v26 = vadd.f32 %v170_v24, %v49_v22  ;;  %v176_v31 = vmax.f32 %v169_v25, 0.0 }
  0xe6   :  { %v172_v28 = vpop.f32.mrf.mxu0 }
  0xe7   :  { %v173_v29 = vadd.f32 %v172_v28, %v53_v21  ;;  %v177_v30 = vmax.f32 %v171_v26, 0.0 }
  0xe9   :  { %v178_v32 = vmax.f32 %v173_v29, 0.0  ;;  %v179_v36 = vpack.c.bf16 %v177_v30, %v175_v33  ;;  %v1740_v30 = vld [vmem:[%s2426_s5 + $0x198] ss:$28 sps:$4 sm:$0xff]   ;;  %v1747_v33 = vld [vmem:[%s2426_s5 + $0x164] ss:$28 sps:$4 sm:$0xff]  }
  0xeb   :  { %v180_v34 = vpack.c.bf16 %v178_v32, %v176_v31  ;;  %v1744_v31 = vld [vmem:[%s2426_s5 + $0x1a0] ss:$28 sps:$4 sm:$0xff]  }
  0xed   :  { %417 = vmatprep.mubr.bf16.mxu1 %v180_v34  ;;  %v1748_v34 = vld [vmem:[%s2426_s5 + $0x328] ss:$28 sps:$4 sm:$0xff]  }
  0xee   :  { %418 = vmatmul.mubr.bf16.vlgmr.msra.gmra.mxu1 %v179_v36  ;;  %v1749_v36 = vld [vmem:[%s2426_s5 + $0x168] ss:$28 sps:$4 sm:$0xff]  }
  0xef   :  { %1219 = vmatpush1.bf16.msra.mxu1 %v1647_v35  ;;  %v1745_v35 = vld [vmem:[%s2426_s5 + $0x160] ss:$28 sps:$4 sm:$0xff]  }
  0xf0   :  { %1220 = vmatprep.subr.bf16.mxu1 %v1655_v37  ;;  %v1752_v37 = vld [vmem:[%s2426_s5 + $0x12c] ss:$28 sps:$4 sm:$0xff]  }
  0xf3   :  { %1221 = vmatpush1.bf16.msra.mxu1 %v1653_v38  ;;  %v1753_v38 = vld [vmem:[%s2426_s5 + $0x2f0] ss:$28 sps:$4 sm:$0xff]  }
  0xf4   :  { %1222 = vmatprep.subr.bf16.mxu1 %v1661_v39  ;;  %v1750_v39 = vld [vmem:[%s2426_s5 + $0x128] ss:$28 sps:$4 sm:$0xff]  }
  0xf7   :  { %1223 = vmatpush1.bf16.msra.mxu1 %v1659_v40  ;;  %v1754_v40 = vld [vmem:[%s2426_s5 + $0x130] ss:$28 sps:$4 sm:$0xff]  }
  0xf8   :  { %1224 = vmatprep.subr.bf16.mxu1 %v1667_v41  ;;  %v1757_v41 = vld [vmem:[%s2426_s5 + $0xf4] ss:$28 sps:$4 sm:$0xff]  }
  0xfb   :  { %1225 = vmatpush1.bf16.msra.mxu1 %v1665_v42  ;;  %v1758_v42 = vld [vmem:[%s2426_s5 + $0x2b8] ss:$28 sps:$4 sm:$0xff]  }
  0xfc   :  { %1226 = vmatprep.subr.bf16.mxu1 %v1673_v43  ;;  %v1755_v43 = vld [vmem:[%s2426_s5 + $0xf0] ss:$28 sps:$4 sm:$0xff]  }
  0xff   :  { %1227 = vmatpush1.bf16.msra.mxu1 %v1671_v44  ;;  %v1759_v44 = vld [vmem:[%s2426_s5 + $0xf8] ss:$28 sps:$4 sm:$0xff]  }
 0x100   :  { %1228 = vmatprep.subr.bf16.mxu1 %v1679_v45  ;;  %v1762_v45 = vld [vmem:[%s2426_s5 + $0xbc] ss:$28 sps:$4 sm:$0xff]  }
 0x103   :  { %1229 = vmatpush1.bf16.msra.mxu1 %v1677_v46  ;;  %v1763_v46 = vld [vmem:[%s2426_s5 + $0x280] ss:$28 sps:$4 sm:$0xff]  }
 0x104   :  { %1230 = vmatprep.subr.bf16.mxu1 %v1685_v47  ;;  %v1760_v47 = vld [vmem:[%s2426_s5 + $0xb8] ss:$28 sps:$4 sm:$0xff]  }
 0x107   :  { %1231 = vmatpush1.bf16.msra.mxu1 %v1683_v48  ;;  %v1764_v48 = vld [vmem:[%s2426_s5 + $0xc0] ss:$28 sps:$4 sm:$0xff]  }
 0x108   :  { %1232 = vmatprep.subr.bf16.mxu1 %v1691_v49  ;;  %v1767_v49 = vld [vmem:[%s2426_s5 + $0x84] ss:$28 sps:$4 sm:$0xff]  }
 0x10b   :  { %1233 = vmatpush1.bf16.msra.mxu1 %v1689_v50  ;;  %v1768_v50 = vld [vmem:[%s2426_s5 + $0x248] ss:$28 sps:$4 sm:$0xff]  }
 0x10c   :  { %1234 = vmatprep.subr.bf16.mxu1 %v1697_v51  ;;  %v1765_v51 = vld [vmem:[%s2426_s5 + $0x80] ss:$28 sps:$4 sm:$0xff]  }
 0x10f   :  { %1235 = vmatpush2.bf16.msra.mxu1 %v1695_v52  ;;  %v1769_v52 = vld [vmem:[%s2426_s5 + $0x88] ss:$28 sps:$4 sm:$0xff]  }
 0x110   :  { %1236 = vmatprep.subr.bf16.mxu1 %v1703_v53  ;;  %v1772_v53 = vld [vmem:[%s2426_s5 + $0x4c] ss:$28 sps:$4 sm:$0xff]  }
 0x113   :  { %1237 = vmatpush2.bf16.msra.mxu1 %v1701_v54  ;;  %v1773_v54 = vld [vmem:[%s2426_s5 + $0x210] ss:$28 sps:$4 sm:$0xff]  }
 0x114   :  { %1238 = vmatprep.subr.bf16.mxu1 %v1709_v55  ;;  %v1770_v55 = vld [vmem:[%s2426_s5 + $0x48] ss:$28 sps:$4 sm:$0xff]  }
 0x117   :  { %1239 = vmatpush2.bf16.msra.mxu1 %v1707_v56  ;;  %v1774_v56 = vld [vmem:[%s2426_s5 + $0x50] ss:$28 sps:$4 sm:$0xff]  }
 0x118   :  { %1240 = vmatprep.subr.bf16.mxu1 %v1715_v57  ;;  %v1777_v57 = vld [vmem:[%s2426_s5 + $0x14] ss:$28 sps:$4 sm:$0xff]  }
 0x11b   :  { %1241 = vmatpush2.bf16.msra.mxu1 %v1713_v58  ;;  %v1778_v58 = vld [vmem:[%s2426_s5 + $0x1d8] ss:$28 sps:$4 sm:$0xff]  }
 0x11c   :  { %1242 = vmatprep.subr.bf16.mxu1 %v1721_v59  ;;  %v1775_v59 = vld [vmem:[%s2426_s5 + $0x10] ss:$28 sps:$4 sm:$0xff]  }
 0x11f   :  { %1243 = vmatpush2.bf16.msra.mxu1 %v1719_v60  ;;  %v1779_v60 = vld [vmem:[%s2426_s5 + $0x18] ss:$28 sps:$4 sm:$0xff]  }
 0x120   :  { %1244 = vmatprep.subr.bf16.mxu1 %v1727_v62  ;;  %v1780_v62 = vld [vmem:[%s2426_s5 + $0x358] ss:$28 sps:$4 sm:$0xff]  }
 0x123   :  { %1245 = vmatpush2.bf16.msra.mxu1 %v1725_v0  ;;  %v1783_v0 = vld [vmem:[%s2426_s5 + $0x320] ss:$28 sps:$4 sm:$0xff]  }
 0x124   :  { %1246 = vmatprep.subr.bf16.mxu1 %v1733_v2  ;;  %v1786_v2 = vld [vmem:[%s2426_s5 + $0x2e8] ss:$28 sps:$4 sm:$0xff]  }
 0x127   :  { %1247 = vmatpush2.bf16.msra.mxu1 %v1731_v4  ;;  %v1789_v4 = vld [vmem:[%s2426_s5 + $0x2b0] ss:$28 sps:$4 sm:$0xff]  }
 0x128   :  { %1248 = vmatprep.subr.bf16.mxu1 %v1739_v6  ;;  %v1792_v6 = vld [vmem:[%s2426_s5 + $0x278] ss:$28 sps:$4 sm:$0xff]  }
 0x12b   :  { %1249 = vmatpush2.bf16.msra.mxu1 %v1737_v8  ;;  %v1795_v8 = vld [vmem:[%s2426_s5 + $0x240] ss:$28 sps:$4 sm:$0xff]  }
 0x12c   :  { %1550 = vmatprep.subr.bf16.mxu1 %v1743_v10  ;;  %v1798_v10 = vld [vmem:[%s2426_s5 + $0x208] ss:$28 sps:$4 sm:$0xff]  }
 0x1ae   :  { %v419_v12 = vpop.f32.mrf.mxu1 }
 0x1af   :  { %v420_v22 = vadd.f32 %v419_v12, %v218_v14  ;;  %v1801_v12 = vld [vmem:[%s2426_s5 + $0x1d0] ss:$28 sps:$4 sm:$0xff]   ;;  %s1855_s5 = smov [#allocation2]  }
 0x1b0   :  { %v421_v15 = vpop.f32.mrf.mxu1 }
 0x1b1   :  { %v422_v20 = vadd.f32 %v421_v15, %v222_v13  ;;  %v428_v28 = vmax.f32 %v420_v22, 0.0  ;;  %v578_v15 = vsub.s32 3, %v2120_v16 }
 0x1b2   :  { %v423_v19 = vpop.f32.mrf.mxu1 }
 0x1b3   :  { %v424_v21 = vadd.f32 %v423_v19, %v218_v14  ;;  %v429_v26 = vmax.f32 %v422_v20, 0.0  ;;  %v2403_v14 = vld [vmem:[%s2427_s6] sm:$0x7f]  ;;  %s1379_s6 = sshll.u32 %s1855_s5, 4  ;;  %s1380_s6 = int_to_ptr.vmem [resolvable:$true] %s1379_s6 }
 0x1b4   :  { %v425_v23 = vpop.f32.mrf.mxu1  ;;  %v567_v19 = vrot.slane %v2403_v14, %v2126_v18  ;;  %v579_v22 = vrot.slane %v2403_v14, %v578_v15  ;;  %s1832_s8 = scalar_lea.vmem %s1380_s6, 1792  ;;  %p1837_p1 = scmp.lt.s32.totalorder %s1380_s6, %s1380_s6 }
 0x1b5   :  { %v426_v24 = vadd.f32 %v425_v23, %v222_v13  ;;  %v430_v25 = vmax.f32 %v424_v21, 0.0  ;;  %v574_v13 = vsub.s32 2, %v2120_v16  ;;  %v571_v21 = vrot.slane %v2403_v14, %v2123_v17  ;;  %p1833_p0 = scmp.ne.s32.totalorder %s1380_s6, %s1832_s8  ;;  %p1838_p2 = scmp.lt.s32.totalorder %s1832_s8, %s1832_s8 }
 0x1b7   :  { %v431_v27 = vmax.f32 %v426_v24, 0.0  ;;  %v2261_v32 = vpack.c.bf16 %v430_v25, %v428_v28  ;;  %v575_v20 = vrot.slane %v2403_v14, %v574_v13  ;;  %p1839_p3 = por %p1838_p2, %p1837_p1 }
 0x1b9   :  { %v433_v29 = vpack.c.bf16 %v431_v27, %v429_v26  ;;  %p1840_p4 = pnand %p1839_p3, %p1833_p0 }
 0x1bb   :  { %1207 = vmatprep.mubr.bf16.mxu0 %v433_v29  ;;  %1250 = vmatprep.mubr.bf16.mxu1 %v433_v29 }
 0x1bc   :  { %1208 = vmatmul.mubr.bf16.vlgmr.msra.gmra.mxu0 %v2261_v32  ;;  %1251 = vmatmul.mubr.bf16.vlgmr.msra.gmra.mxu1 %v2261_v32 }
 0x1bd   :  { %1262 = vmatpush1.bf16.msra.mxu0 %v1740_v30  ;;  %1551 = vmatpush3.bf16.msra.mxu1 %v1744_v31 }
 0x1be   :  { %1293 = vmatprep.mubr.bf16.mxu0 %v433_v29  ;;  %1336 = vmatprep.mubr.bf16.mxu1 %v433_v29 }
 0x1bf   :  { %1263 = vmatprep.subr.bf16.mxu0 %v1747_v33  ;;  %1552 = vmatprep.subr.bf16.mxu1 %v1748_v34 }
 0x1c1   :  { %1264 = vmatpush1.bf16.msra.mxu0 %v1745_v35  ;;  %1553 = vmatpush3.bf16.msra.mxu1 %v1749_v36 }
 0x1c2   :  { %1265 = vmatprep.subr.bf16.mxu0 %v1752_v37  ;;  %1554 = vmatprep.subr.bf16.mxu1 %v1753_v38 }
 0x1c5   :  { %1266 = vmatpush1.bf16.msra.mxu0 %v1750_v39  ;;  %1555 = vmatpush3.bf16.msra.mxu1 %v1754_v40 }
 0x1c6   :  { %1267 = vmatprep.subr.bf16.mxu0 %v1757_v41  ;;  %1556 = vmatprep.subr.bf16.mxu1 %v1758_v42 }
 0x1c9   :  { %1268 = vmatpush1.bf16.msra.mxu0 %v1755_v43  ;;  %1557 = vmatpush3.bf16.msra.mxu1 %v1759_v44 }
 0x1ca   :  { %1269 = vmatprep.subr.bf16.mxu0 %v1762_v45  ;;  %1558 = vmatprep.subr.bf16.mxu1 %v1763_v46  ;;  %v590_v45 = vsub.s32 6, %v2120_v16 }
 0x1cd   :  { %1270 = vmatpush1.bf16.msra.mxu0 %v1760_v47  ;;  %1559 = vmatpush3.bf16.msra.mxu1 %v1764_v48  ;;  %v591_v47 = vrot.slane %v2403_v14, %v590_v45 }
 0x1ce   :  { %1271 = vmatprep.subr.bf16.mxu0 %v1767_v49  ;;  %1560 = vmatprep.subr.bf16.mxu1 %v1768_v50 }
 0x1d1   :  { %1272 = vmatpush1.bf16.msra.mxu0 %v1765_v51  ;;  %1561 = vmatpush3.bf16.msra.mxu1 %v1769_v52 }
 0x1d2   :  { %1273 = vmatprep.subr.bf16.mxu0 %v1772_v53  ;;  %1562 = vmatprep.subr.bf16.mxu1 %v1773_v54 }
 0x1d5   :  { %1274 = vmatpush1.bf16.msra.mxu0 %v1770_v55  ;;  %1563 = vmatpush3.bf16.msra.mxu1 %v1774_v56 }
 0x1d6   :  { %1275 = vmatprep.subr.bf16.mxu0 %v1777_v57  ;;  %1564 = vmatprep.subr.bf16.mxu1 %v1778_v58  ;;  %v582_v57 = vsub.s32 4, %v2120_v16  ;;  %v586_v58 = vsub.s32 5, %v2120_v16 }
 0x1d9   :  { %1276 = vmatpush1.bf16.msra.mxu0 %v1775_v59  ;;  %1565 = vmatpush3.bf16.msra.mxu1 %v1779_v60  ;;  %v583_v59 = vrot.slane %v2403_v14, %v582_v57  ;;  %v587_v60 = vrot.slane %v2403_v14, %v586_v58 }
 0x1da   :  { %1277 = vmatprep.subr.bf16.mxu0 %v1782_v61 }
 0x1dc   :  { %1337 = vmatmul.mubr.bf16.vlgmr.msra.gmra.mxu1 %v2261_v32 }
 0x1dd   :  { %1278 = vmatpush2.bf16.msra.mxu0 %v1780_v62 }
 0x1de   :  { %1279 = vmatprep.subr.bf16.mxu0 %v1785_v63 }
 0x1e1   :  { %1280 = vmatpush2.bf16.msra.mxu0 %v1783_v0 }
 0x1e2   :  { %1281 = vmatprep.subr.bf16.mxu0 %v1788_v1 }
 0x1e5   :  { %1282 = vmatpush2.bf16.msra.mxu0 %v1786_v2 }
 0x1e6   :  { %1283 = vmatprep.subr.bf16.mxu0 %v1791_v3 }
 0x1e9   :  { %1284 = vmatpush2.bf16.msra.mxu0 %v1789_v4 }
 0x1ea   :  { %1285 = vmatprep.subr.bf16.mxu0 %v1794_v5 }
 0x1ed   :  { %1286 = vmatpush2.bf16.msra.mxu0 %v1792_v6 }
 0x1ee   :  { %1287 = vmatprep.subr.bf16.mxu0 %v1797_v7 }
 0x1f1   :  { %1288 = vmatpush2.bf16.msra.mxu0 %v1795_v8 }
 0x1f2   :  { %1289 = vmatprep.subr.bf16.mxu0 %v1800_v9 }
 0x1f5   :  { %1290 = vmatpush2.bf16.msra.mxu0 %v1798_v10 }
 0x1f6   :  { %1291 = vmatprep.subr.bf16.mxu0 %v1803_v11 }
 0x1f9   :  { %1292 = vmatpush2.bf16.msra.mxu0 %v1801_v12 }
 0x1fc   :  { %1294 = vmatmul.mubr.bf16.vlgmr.msra.gmra.mxu0 %v2261_v32 }
 0x27c   :  { %v1209_v23 = vpop.f32.mrf.mxu0  ;;  %v1252_v24 = vpop.f32.mrf.mxu1 }
 0x27d   :  { %v1210_v25 = vadd.f32 %v1209_v23, %v567_v19  ;;  %v1253_v26 = vadd.f32 %v1252_v24, %v575_v20 }
 0x27e   :  { %v1211_v27 = vpop.f32.mrf.mxu0  ;;  %v1254_v28 = vpop.f32.mrf.mxu1 }
 0x27f   :  { %1804 = vtanh.f32 %v1210_v25  ;;  %v1212_v29 = vadd.f32 %v1211_v27, %v571_v21  ;;  %v1255_v30 = vadd.f32 %v1254_v28, %v579_v22 }
 0x280   :  { %1806 = vtanh.f32 %v1253_v26  ;;  %v1213_v31 = vpop.f32.mrf.mxu0  ;;  %v1256_v32 = vpop.f32.mrf.mxu1 }
 0x281   :  { %1808 = vtanh.f32 %v1212_v29  ;;  %v1214_v18 = vadd.f32 %v1213_v31, %v567_v19  ;;  %v1257_v33 = vadd.f32 %v1256_v32, %v575_v20 }
 0x282   :  { %1810 = vtanh.f32 %v1255_v30  ;;  %v1215_v34 = vpop.f32.mrf.mxu0  ;;  %v1258_v17 = vpop.f32.mrf.mxu1 }
 0x283   :  { %1812 = vtanh.f32 %v1214_v18  ;;  %v1216_v35 = vadd.f32 %v1215_v34, %v571_v21  ;;  %v1259_v36 = vadd.f32 %v1258_v17, %v579_v22 }
 0x284   :  { %1814 = vtanh.f32 %v1257_v33 }
 0x285   :  { %1816 = vtanh.f32 %v1216_v35 }
 0x286   :  { %1818 = vtanh.f32 %v1259_v36 }
 0x28c   :  { %v1805_v37 = vpop.eup %1804 }
 0x28d   :  { %v1807_v38 = vpop.eup %1806  ;;  %1359 = vst [vmem:[#allocation2] sm:$0xff] %v1805_v37 }
 0x28e   :  { %v1809_v39 = vpop.eup %1808  ;;  %1361 = vst [vmem:[#allocation2 + $0x10] sm:$0xff] %v1807_v38 }
 0x28f   :  { %v1811_v40 = vpop.eup %1810  ;;  %1360 = vst [vmem:[#allocation2 + $0x8] sm:$0xff] %v1809_v39 }
 0x290   :  { %v1813_v41 = vpop.eup %1812  ;;  %1362 = vst [vmem:[#allocation2 + $0x18] sm:$0xff] %v1811_v40 }
 0x291   :  { %v1815_v42 = vpop.eup %1814  ;;  %1367 = vst [vmem:[#allocation2 + $0x38] sm:$0xff] %v1813_v41 }
 0x292   :  { %v1817_v43 = vpop.eup %1816  ;;  %1369 = vst [vmem:[#allocation2 + $0x48] sm:$0xff] %v1815_v42 }
 0x293   :  { %v1819_v44 = vpop.eup %1818  ;;  %1368 = vst [vmem:[#allocation2 + $0x40] sm:$0xff] %v1817_v43 }
 0x294   :  { %1370 = vst [vmem:[#allocation2 + $0x50] sm:$0xff] %v1819_v44 }
 0x29c   :  { %v1566_v46 = vpop.f32.mrf.mxu1 }
 0x29e   :  { %v1567_v48 = vpop.f32.mrf.mxu1 }
 0x29f   :  { %v1568_v49 = vadd.f32 %v1567_v48, %v1566_v46 }
 0x2a0   :  { %v1569_v50 = vpop.f32.mrf.mxu1 }
 0x2a1   :  { %v1339_v51 = vadd.f32 %v1568_v49, %v591_v47 }
 0x2a2   :  { %v1570_v52 = vpop.f32.mrf.mxu1 }
 0x2a3   :  { %1820 = vtanh.f32 %v1339_v51  ;;  %v1571_v53 = vadd.f32 %v1570_v52, %v1569_v50 }
 0x2a5   :  { %v1342_v54 = vadd.f32 %v1571_v53, %v591_v47 }
 0x2a7   :  { %1822 = vtanh.f32 %v1342_v54 }
 0x2b0   :  { %v1821_v55 = vpop.eup %1820 }
 0x2b1   :  { %1366 = vst.msk [vmem:[#allocation2 + $0x30] sm:$0xff] %vm1365_vm2, %v1821_v55 }
 0x2b4   :  { %v1823_v56 = vpop.eup %1822 }
 0x2b5   :  { %1373 = vst.msk [vmem:[#allocation2 + $0x68] sm:$0xff] %vm1365_vm2, %v1823_v56 }
 0x2bc   :  { %v1295_v61 = vpop.f32.mrf.mxu0 }
 0x2bd   :  { %v1296_v62 = vadd.f32 %v1295_v61, %v583_v59 }
 0x2be   :  { %v1297_v63 = vpop.f32.mrf.mxu0 }
 0x2bf   :  { %1824 = vtanh.f32 %v1296_v62  ;;  %v1298_v0 = vadd.f32 %v1297_v63, %v587_v60 }
 0x2c0   :  { %v1299_v1 = vpop.f32.mrf.mxu0 }
 0x2c1   :  { %1826 = vtanh.f32 %v1298_v0  ;;  %v1300_v2 = vadd.f32 %v1299_v1, %v583_v59 }
 0x2c2   :  { %v1301_v3 = vpop.f32.mrf.mxu0 }
 0x2c3   :  { %1828 = vtanh.f32 %v1300_v2  ;;  %v1302_v4 = vadd.f32 %v1301_v3, %v587_v60 }
 0x2c5   :  { %1830 = vtanh.f32 %v1302_v4 }
 0x2cc   :  { %v1825_v5 = vpop.eup %1824 }
 0x2cd   :  { %1363 = vst [vmem:[#allocation2 + $0x20] sm:$0xff] %v1825_v5 }
 0x2ce   :  { %v1827_v16 = vpop.eup %1826 }
 0x2cf   :  { %1364 = vst [vmem:[#allocation2 + $0x28] sm:$0xff] %v1827_v16 }
 0x2d0   :  { %v1829_v6 = vpop.eup %1828 }
 0x2d1   :  { %1371 = vst [vmem:[#allocation2 + $0x58] sm:$0xff] %v1829_v6 }
 0x2d2   :  { %v1831_v7 = vpop.eup %1830 }
 0x2d3   :  { %1372 = vst [vmem:[#allocation2 + $0x60] sm:$0xff] %v1831_v7 }
 0x2d4   :  { %1843 = shalt.err (!%p1840_p4)
}
 0x2d5   :  { %s1856_s9 = smov 896   ;;  %s1857_s0 = smov 56  }
 0x2d6   :  { %1385 = dma.vmem_to_hbm [thread:$0]  %s1380_s6, 1792, %s2428_s7, [#allocation3], %s1856_s9, %s1856_s9, %s1857_s0  }
 0x2d7   :  { %1852 = dma.done.wait [#allocation3], 1792  }
 0x2d8   :  { %1853 = vsyncadd [#allocation3], 4294965504 }
 0x2d9   :  { %1389 = vsyncpa [#allocation3], 1 }

</bundles_post_ra>
